<compile_context>
chip_gen: v7x
topology: tpu7x:2x2x1
jax: 0.10.0
libtpu: 0.0.40
codegen_flags: <defaults>
</compile_context>

<pallas_src>
import functools

import jax
import jax.numpy as jnp
from jax.experimental import pallas as pl
from jax.experimental.pallas import tpu as pltpu


def _round_up(n, m):
    return ((n + m - 1) // m) * m


def _fcnet3_kernel(t_ref, x_ref, w1_ref, b1_ref, w2_ref, b2_ref,
                   wh_ref, bh_ref, o_ref, *, bound):
    # ----- linear1 entirely on the VPU -------------------------------------
    # z = [1 - t, x];  z @ W1 + b1
    #   = (b1 + W1_row_t) + t * (-W1_row_t) + sum_k x[:, k] * W1_row_xk
    # w1_ref row 0 already holds -W1_row_t and b1_ref the fused bias, so the
    # whole layer is (1 + xdim) broadcast multiply-adds (no MXU, no concat).
    h = t_ref[...] * w1_ref[0:1, :] + b1_ref[...]          # (TB, Hp)
    xdim = x_ref.shape[1]
    for k in range(xdim):
        h = h + x_ref[:, k:k + 1] * w1_ref[k + 1:k + 2, :]
    # ReLU + clamp fused (bound > 0 makes the lower clamp after ReLU dead).
    h = jnp.clip(h, 0.0, bound)

    # ----- residual linear2 (MXU, bf16 operands / f32 accumulation) --------
    h = h + jnp.dot(h.astype(w2_ref.dtype), w2_ref[...],
                    preferred_element_type=jnp.float32) + b2_ref[...]
    h = jnp.clip(h, 0.0, bound)

    # ----- head -------------------------------------------------------------
    out = jnp.dot(h.astype(wh_ref.dtype), wh_ref[...],
                  preferred_element_type=jnp.float32) + bh_ref[...]
    out = jnp.clip(out, -bound, bound)
    # Store only the logical wdim lanes (output array is unpadded).
    o_ref[...] = out[:, :o_ref.shape[1]]


def fcnet3_bound_forward(t, x, params, bound, *, batch_tile=2048,
                         use_bf16_matmul=True):
    """t: (B, 1), x: (B, xdim) -> (B, wdim).

    params = (w1, b1, w2, b2, wh, bh) with weights stored as
    (in_features, out_features) (i.e. PyTorch W.T) and biases as (1, out).
    """
    w1, b1, w2, b2, wh, bh = params

    B = t.shape[0]
    xdim = x.shape[1]
    H = w1.shape[1]
    wdim = wh.shape[1]

    f32 = jnp.float32
    mm_dtype = jnp.bfloat16 if use_bf16_matmul else f32

    Hp = _round_up(H, 128)       # hidden dim, lane padded
    Whp = _round_up(wdim, 128)   # head-weight lane pad (matmul only; output unpadded)

    def pad2(a, rows, cols, dtype):
        a = a.astype(f32)
        a = jnp.pad(a, ((0, rows - a.shape[0]), (0, cols - a.shape[1])))
        return a.astype(dtype)

    # linear1 folded for the VPU path: row 0 multiplies t (negated), rows
    # 1..xdim multiply x, and the constant (1-t)->1 part goes into the bias.
    w1 = w1.astype(f32)
    w1_adj = jnp.concatenate([-w1[:1, :], w1[1:, :]], axis=0)   # (1+xdim, H)
    b1_fused = b1.astype(f32) + w1[:1, :]                       # (1, H)

    w1p = pad2(w1_adj, 1 + xdim, Hp, f32)
    b1p = pad2(b1_fused, 1, Hp, f32)
    w2p = pad2(w2, Hp, Hp, mm_dtype)
    b2p = pad2(b2, 1, Hp, f32)
    whp = pad2(wh, Hp, Whp, mm_dtype)
    bhp = pad2(bh, 1, Whp, f32)

    # --- batch tiling --------------------------------------------------------
    B8 = _round_up(B, 8)
    # >= 2 tiles so a v7x megacore can split the batch across its TensorCores;
    # tiles sized to divide B tightly so padding waste stays small.
    n_tiles = max(2, pl.cdiv(B8, batch_tile))
    TB = _round_up(pl.cdiv(B8, n_tiles), 8)
    Bp = _round_up(B, TB)

    tp = t.astype(f32)
    xp = x.astype(f32)
    if Bp != B:   # only pad when actually needed (avoid extra HBM passes)
        tp = jnp.pad(tp, ((0, Bp - B), (0, 0)))
        xp = jnp.pad(xp, ((0, Bp - B), (0, 0)))

    grid = (Bp // TB,)

    # Weights stay VMEM-resident (constant block index across the grid).
    const_spec = lambda shape: pl.BlockSpec(shape, lambda i: (0, 0))
    in_specs = [
        pl.BlockSpec((TB, 1), lambda i: (i, 0)),       # t
        pl.BlockSpec((TB, xdim), lambda i: (i, 0)),    # x
        const_spec((1 + xdim, Hp)),                    # w1 (adjusted rows)
        const_spec((1, Hp)),                           # b1 (fused)
        const_spec((Hp, Hp)),                          # w2
        const_spec((1, Hp)),                           # b2
        const_spec((Hp, Whp)),                         # wh
        const_spec((1, Whp)),                          # bh
    ]
    # Unpadded output: (TB, wdim) block; last dim == full array dim is legal.
    out_specs = pl.BlockSpec((TB, wdim), lambda i: (i, 0))

    mm_bytes = jnp.dtype(mm_dtype).itemsize
    weight_bytes = (4 * ((1 + xdim) * Hp + 3 * Hp + Whp)
                    + mm_bytes * (Hp * Hp + Hp * Whp))
    cost = pl.CostEstimate(
        flops=2 * Bp * ((1 + xdim) * Hp + Hp * Hp + Hp * wdim),
        transcendentals=0,
        bytes_accessed=Bp * (1 + xdim + wdim) * 4 + weight_bytes,
    )

    kernel = functools.partial(_fcnet3_kernel, bound=float(bound))
    out = pl.pallas_call(
        kernel,
        out_shape=jax.ShapeDtypeStruct((Bp, wdim), f32),
        grid=grid,
        in_specs=in_specs,
        out_specs=out_specs,
        compiler_params=pltpu.CompilerParams(
            dimension_semantics=("parallel",),
            vmem_limit_bytes=32 * 1024 * 1024,   # safe on v5e/v6e/v7x
        ),
        cost_estimate=cost,
    )(tp, xp, w1p, b1p, w2p, b2p, whp, bhp)

    if Bp != B:
        out = out[:B]
    return out


def init_params(key, xdim, wdim, hidden_size):
    """Deterministic init mirroring init_parameters_: xavier_uniform weights,
    normal biases. Weights are returned as (in, out) = PyTorch W.T."""
    k1, k2, k3, k4, k5, k6 = jax.random.split(key, 6)

    def xavier(k, fan_in, fan_out):
        limit = jnp.sqrt(6.0 / (fan_in + fan_out))
        return jax.random.uniform(k, (fan_in, fan_out), jnp.float32,
                                  minval=-limit, maxval=limit)

    w1 = xavier(k1, 1 + xdim, hidden_size)
    b1 = jax.random.normal(k2, (1, hidden_size), jnp.float32)
    w2 = xavier(k3, hidden_size, hidden_size)
    b2 = jax.random.normal(k4, (1, hidden_size), jnp.float32)
    wh = xavier(k5, hidden_size, wdim)
    bh = jax.random.normal(k6, (1, wdim), jnp.float32)
    return (w1, b1, w2, b2, wh, bh)


def _reference_forward(t, x, params, bound):
    w1, b1, w2, b2, wh, bh = params
    z = jnp.concatenate([1.0 - t, x], axis=-1)
    h = jnp.maximum(z @ w1 + b1, 0.0)
    h = jnp.clip(h, -bound, bound)
    h = h + (h @ w2 + b2)
    h = jnp.maximum(h, 0.0)
    h = jnp.clip(h, -bound, bound)
    return jnp.clip(h @ wh + bh, -bound, bound)


if __name__ == "__main__":
    # Small shapes consistent with the module: xdim=4, wdim=2, hidden=32.
    B, XDIM, WDIM, HIDDEN = 8, 4, 2, 32
    BOUND = 10.0

    key = jax.random.PRNGKey(0)
    kp, kt, kx = jax.random.split(key, 3)

    params = init_params(kp, XDIM, WDIM, HIDDEN)
    t = jax.random.uniform(kt, (B, 1), jnp.float32)
    x = jax.random.normal(kx, (B, XDIM), jnp.float32)

    ref = _reference_forward(t, x, params, BOUND)

    # Exact-semantics check: f32 matmuls.
    out_f32 = jax.block_until_ready(
        fcnet3_bound_forward(t, x, params, BOUND, use_bf16_matmul=False))
    assert out_f32.shape == (B, WDIM)
    assert jnp.allclose(out_f32, ref, atol=1e-5, rtol=1e-5)

    # Performance path: bf16 MXU operands, f32 accumulation (looser tolerance).
    out_bf16 = jax.block_until_ready(
        fcnet3_bound_forward(t, x, params, BOUND))
    assert out_bf16.shape == (B, WDIM)
    assert float(jnp.max(jnp.abs(out_bf16 - ref))) < 0.2

    print("KERNEL_OK")
</pallas_src>

<mosaic_0001>
module attributes {stable_mosaic.version = 11 : i64} {
  func.func @_fcnet3_kernel(%arg0: i32, %arg1: memref<8x1xf32, #tpu.memory_space<vmem>>, %arg2: memref<8x4xf32, #tpu.memory_space<vmem>>, %arg3: memref<5x128xf32, #tpu.memory_space<vmem>>, %arg4: memref<1x128xf32, #tpu.memory_space<vmem>>, %arg5: memref<128x128xf32, #tpu.memory_space<vmem>>, %arg6: memref<1x128xf32, #tpu.memory_space<vmem>>, %arg7: memref<128x128xf32, #tpu.memory_space<vmem>>, %arg8: memref<1x128xf32, #tpu.memory_space<vmem>>, %arg9: memref<8x2xf32, #tpu.memory_space<vmem>>) attributes {dimension_semantics = [#tpu.dimension_semantics<parallel>], iteration_bounds = array<i64: 1>, scalar_prefetch = 0 : i64, scratch_operands = 0 : i64, tpu.core_type = #tpu.core_type<tc>, window_params = [{transform_indices = @transform_0, window_bounds = array<i64: 8, 1>}, {transform_indices = @transform_1, window_bounds = array<i64: 8, 4>}, {pipeline_mode = #tpu.pipeline_mode<synchronous>, transform_indices = @transform_2, window_bounds = array<i64: 5, 128>}, {pipeline_mode = #tpu.pipeline_mode<synchronous>, transform_indices = @transform_3, window_bounds = array<i64: 1, 128>}, {pipeline_mode = #tpu.pipeline_mode<synchronous>, transform_indices = @transform_4, window_bounds = array<i64: 128, 128>}, {pipeline_mode = #tpu.pipeline_mode<synchronous>, transform_indices = @transform_5, window_bounds = array<i64: 1, 128>}, {pipeline_mode = #tpu.pipeline_mode<synchronous>, transform_indices = @transform_6, window_bounds = array<i64: 128, 128>}, {pipeline_mode = #tpu.pipeline_mode<synchronous>, transform_indices = @transform_7, window_bounds = array<i64: 1, 128>}, {transform_indices = @transform_8, window_bounds = array<i64: 8, 2>}]} {
    %c0 = arith.constant 0 : index
    %c0_0 = arith.constant 0 : index
    %0 = vector.load %arg1[%c0, %c0_0] : memref<8x1xf32, #tpu.memory_space<vmem>>, vector<8x1xf32>
    %c0_1 = arith.constant 0 : index
    %c0_2 = arith.constant 0 : index
    %1 = vector.load %arg3[%c0_1, %c0_2] : memref<5x128xf32, #tpu.memory_space<vmem>>, vector<1x128xf32>
    %2 = vector.broadcast %0 : vector<8x1xf32> to vector<8x128xf32>
    %3 = vector.broadcast %1 : vector<1x128xf32> to vector<8x128xf32>
    %4 = arith.mulf %2, %3 : vector<8x128xf32>
    %c0_3 = arith.constant 0 : index
    %c0_4 = arith.constant 0 : index
    %5 = vector.load %arg4[%c0_3, %c0_4] : memref<1x128xf32, #tpu.memory_space<vmem>>, vector<1x128xf32>
    %6 = vector.broadcast %5 : vector<1x128xf32> to vector<8x128xf32>
    %7 = arith.addf %4, %6 : vector<8x128xf32>
    %c0_5 = arith.constant 0 : index
    %c0_6 = arith.constant 0 : index
    %8 = vector.load %arg2[%c0_5, %c0_6] : memref<8x4xf32, #tpu.memory_space<vmem>>, vector<8x1xf32>
    %c1 = arith.constant 1 : index
    %c0_7 = arith.constant 0 : index
    %9 = vector.load %arg3[%c1, %c0_7] : memref<5x128xf32, #tpu.memory_space<vmem>>, vector<1x128xf32>
    %10 = vector.broadcast %8 : vector<8x1xf32> to vector<8x128xf32>
    %11 = vector.broadcast %9 : vector<1x128xf32> to vector<8x128xf32>
    %12 = arith.mulf %10, %11 : vector<8x128xf32>
    %13 = arith.addf %7, %12 : vector<8x128xf32>
    %c0_8 = arith.constant 0 : index
    %c1_9 = arith.constant 1 : index
    %14 = vector.load %arg2[%c0_8, %c1_9] : memref<8x4xf32, #tpu.memory_space<vmem>>, vector<8x1xf32>
    %c2 = arith.constant 2 : index
    %c0_10 = arith.constant 0 : index
    %15 = vector.load %arg3[%c2, %c0_10] : memref<5x128xf32, #tpu.memory_space<vmem>>, vector<1x128xf32>
    %16 = vector.broadcast %14 : vector<8x1xf32> to vector<8x128xf32>
    %17 = vector.broadcast %15 : vector<1x128xf32> to vector<8x128xf32>
    %18 = arith.mulf %16, %17 : vector<8x128xf32>
    %19 = arith.addf %13, %18 : vector<8x128xf32>
    %c0_11 = arith.constant 0 : index
    %c2_12 = arith.constant 2 : index
    %20 = vector.load %arg2[%c0_11, %c2_12] : memref<8x4xf32, #tpu.memory_space<vmem>>, vector<8x1xf32>
    %c3 = arith.constant 3 : index
    %c0_13 = arith.constant 0 : index
    %21 = vector.load %arg3[%c3, %c0_13] : memref<5x128xf32, #tpu.memory_space<vmem>>, vector<1x128xf32>
    %22 = vector.broadcast %20 : vector<8x1xf32> to vector<8x128xf32>
    %23 = vector.broadcast %21 : vector<1x128xf32> to vector<8x128xf32>
    %24 = arith.mulf %22, %23 : vector<8x128xf32>
    %25 = arith.addf %19, %24 : vector<8x128xf32>
    %c0_14 = arith.constant 0 : index
    %c3_15 = arith.constant 3 : index
    %26 = vector.load %arg2[%c0_14, %c3_15] : memref<8x4xf32, #tpu.memory_space<vmem>>, vector<8x1xf32>
    %c4 = arith.constant 4 : index
    %c0_16 = arith.constant 0 : index
    %27 = vector.load %arg3[%c4, %c0_16] : memref<5x128xf32, #tpu.memory_space<vmem>>, vector<1x128xf32>
    %28 = vector.broadcast %26 : vector<8x1xf32> to vector<8x128xf32>
    %29 = vector.broadcast %27 : vector<1x128xf32> to vector<8x128xf32>
    %30 = arith.mulf %28, %29 : vector<8x128xf32>
    %31 = arith.addf %25, %30 : vector<8x128xf32>
    %cst = arith.constant 0.000000e+00 : f32
    %cst_17 = arith.constant 1.000000e+01 : f32
    %32 = vector.broadcast %cst : f32 to vector<8x128xf32>
    %33 = arith.maximumf %32, %31 : vector<8x128xf32>
    %34 = vector.broadcast %cst_17 : f32 to vector<8x128xf32>
    %35 = arith.minimumf %34, %33 : vector<8x128xf32>
    %c0_18 = arith.constant 0 : index
    %c0_19 = arith.constant 0 : index
    %36 = vector.load %arg5[%c0_18, %c0_19] : memref<128x128xf32, #tpu.memory_space<vmem>>, vector<128x128xf32>
    %cst_20 = arith.constant dense<0.000000e+00> : vector<8x128xf32>
    %37 = tpu.matmul %35, %36, %cst_20 {dimension_numbers = #tpu.dot_dimension_numbers<[1], [0], [0], [1], [0, 0, 1, 1], [], []>} : vector<8x128xf32>, vector<128x128xf32>, vector<8x128xf32> -> vector<8x128xf32>
    %38 = arith.addf %35, %37 : vector<8x128xf32>
    %c0_21 = arith.constant 0 : index
    %c0_22 = arith.constant 0 : index
    %39 = vector.load %arg6[%c0_21, %c0_22] : memref<1x128xf32, #tpu.memory_space<vmem>>, vector<1x128xf32>
    %40 = vector.broadcast %39 : vector<1x128xf32> to vector<8x128xf32>
    %41 = arith.addf %38, %40 : vector<8x128xf32>
    %cst_23 = arith.constant 0.000000e+00 : f32
    %cst_24 = arith.constant 1.000000e+01 : f32
    %42 = vector.broadcast %cst_23 : f32 to vector<8x128xf32>
    %43 = arith.maximumf %42, %41 : vector<8x128xf32>
    %44 = vector.broadcast %cst_24 : f32 to vector<8x128xf32>
    %45 = arith.minimumf %44, %43 : vector<8x128xf32>
    %c0_25 = arith.constant 0 : index
    %c0_26 = arith.constant 0 : index
    %46 = vector.load %arg7[%c0_25, %c0_26] : memref<128x128xf32, #tpu.memory_space<vmem>>, vector<128x128xf32>
    %cst_27 = arith.constant dense<0.000000e+00> : vector<8x128xf32>
    %47 = tpu.matmul %45, %46, %cst_27 {dimension_numbers = #tpu.dot_dimension_numbers<[1], [0], [0], [1], [0, 0, 1, 1], [], []>} : vector<8x128xf32>, vector<128x128xf32>, vector<8x128xf32> -> vector<8x128xf32>
    %c0_28 = arith.constant 0 : index
    %c0_29 = arith.constant 0 : index
    %48 = vector.load %arg8[%c0_28, %c0_29] : memref<1x128xf32, #tpu.memory_space<vmem>>, vector<1x128xf32>
    %49 = vector.broadcast %48 : vector<1x128xf32> to vector<8x128xf32>
    %50 = arith.addf %47, %49 : vector<8x128xf32>
    %cst_30 = arith.constant -1.000000e+01 : f32
    %cst_31 = arith.constant 1.000000e+01 : f32
    %51 = vector.broadcast %cst_30 : f32 to vector<8x128xf32>
    %52 = arith.maximumf %51, %50 : vector<8x128xf32>
    %53 = vector.broadcast %cst_31 : f32 to vector<8x128xf32>
    %54 = arith.minimumf %53, %52 : vector<8x128xf32>
    %55 = vector.extract_strided_slice %54 {offsets = [0, 0], sizes = [8, 2], strides = [1, 1]} : vector<8x128xf32> to vector<8x2xf32>
    %c0_32 = arith.constant 0 : index
    %c0_33 = arith.constant 0 : index
    %56 = vector.load %arg9[%c0_32, %c0_33] : memref<8x2xf32, #tpu.memory_space<vmem>>, vector<8x2xf32>
    tpu.vector_store %arg9[%c0_32, %c0_33], %55 {strides = array<i32>} : memref<8x2xf32, #tpu.memory_space<vmem>>, vector<8x2xf32>,
    return
  }
  func.func @transform_0(%arg0: i32) -> (i32, i32) {
    %c0_i32 = arith.constant 0 : i32
    %c0_i32_0 = arith.constant 0 : i32
    return %arg0, %c0_i32 : i32, i32
  }
  func.func @transform_1(%arg0: i32) -> (i32, i32) {
    %c0_i32 = arith.constant 0 : i32
    %c0_i32_0 = arith.constant 0 : i32
    return %arg0, %c0_i32 : i32, i32
  }
  func.func @transform_2(%arg0: i32) -> (i32, i32) {
    %c0_i32 = arith.constant 0 : i32
    %c0_i32_0 = arith.constant 0 : i32
    %c0_i32_1 = arith.constant 0 : i32
    return %c0_i32, %c0_i32_0 : i32, i32
  }
  func.func @transform_3(%arg0: i32) -> (i32, i32) {
    %c0_i32 = arith.constant 0 : i32
    %c0_i32_0 = arith.constant 0 : i32
    %c0_i32_1 = arith.constant 0 : i32
    return %c0_i32, %c0_i32_0 : i32, i32
  }
  func.func @transform_4(%arg0: i32) -> (i32, i32) {
    %c0_i32 = arith.constant 0 : i32
    %c0_i32_0 = arith.constant 0 : i32
    %c0_i32_1 = arith.constant 0 : i32
    return %c0_i32, %c0_i32_0 : i32, i32
  }
  func.func @transform_5(%arg0: i32) -> (i32, i32) {
    %c0_i32 = arith.constant 0 : i32
    %c0_i32_0 = arith.constant 0 : i32
    %c0_i32_1 = arith.constant 0 : i32
    return %c0_i32, %c0_i32_0 : i32, i32
  }
  func.func @transform_6(%arg0: i32) -> (i32, i32) {
    %c0_i32 = arith.constant 0 : i32
    %c0_i32_0 = arith.constant 0 : i32
    %c0_i32_1 = arith.constant 0 : i32
    return %c0_i32, %c0_i32_0 : i32, i32
  }
  func.func @transform_7(%arg0: i32) -> (i32, i32) {
    %c0_i32 = arith.constant 0 : i32
    %c0_i32_0 = arith.constant 0 : i32
    %c0_i32_1 = arith.constant 0 : i32
    return %c0_i32, %c0_i32_0 : i32, i32
  }
  func.func @transform_8(%arg0: i32) -> (i32, i32) {
    %c0_i32 = arith.constant 0 : i32
    %c0_i32_0 = arith.constant 0 : i32
    return %arg0, %c0_i32 : i32, i32
  }
}

</mosaic_0001>

<bundles_post_ra>
// kernel: tpu_custom_call.1
= control target key start
LH: loop header
LB: loop body
LE: loop exit
PB: predicated region body
PF: predicated region fallthrough
CT: control target
= control target key end

     0   :  { %13 = vsyncpa [#allocation3], 0  ;;  %s678_s0 = inlined_call_operand.vmem [shape: f32[8,1], index: 0, kind: input, shape index: {}]   ;;  %s679_s1 = inlined_call_operand.vmem [shape: f32[8,4], index: 1, kind: input, shape index: {}]   ;;  %s680_s2 = inlined_call_operand.vmem [shape: f32[5,128], index: 2, kind: input, shape index: {}]   ;;  %s681_s3 = inlined_call_operand.vmem [shape: f32[1,128], index: 3, kind: input, shape index: {}]   ;;  %s682_s4 = inlined_call_operand.hbm [shape: f32[128,128], index: 4, kind: input, shape index: {}]   ;;  %s683_s5 = inlined_call_operand.vmem [shape: f32[1,128], index: 5, kind: input, shape index: {}]   ;;  %s684_s6 = inlined_call_operand.hbm [shape: f32[128,128], index: 6, kind: input, shape index: {}]   ;;  %s685_s7 = inlined_call_operand.vmem [shape: f32[1,128], index: 7, kind: input, shape index: {}]   ;;  %s686_s8 = inlined_call_operand.vmem [shape: f32[8,2], index: 8, kind: output, shape index: {}]  }
   0x1   :  { %14 = vsyncpa [#allocation5], 0  ;;  %s549_s27 = smov [#allocation2]   ;;  %s501_s9 = scalar_lea.hbm %s682_s4, 2048 }
   0x2   :  { %s28_s28 = sshll.u32 %s549_s27, 4  ;;  %p502_p0 = scmp.ne.s32.totalorder %s682_s4, %s501_s9  ;;  %s29_s28 = int_to_ptr.vmem [resolvable:$true] %s28_s28 }
   0x3   :  { %p505_p1 = scmp.lt.u32.totalorder %s501_s9, %s682_s4 }
   0x5   :  { %p507_p2 = pnand %p505_p1, %p502_p0 }
   0x7   :  { %510 = shalt.err (!%p507_p2)
}
   0x8   :  { %s511_s14 = scalar_lea.vmem %s29_s28, 2048  ;;  %p516_p4 = scmp.lt.s32.totalorder %s29_s28, %s29_s28 }
   0x9   :  { %p512_p3 = scmp.ne.s32.totalorder %s29_s28, %s511_s14  ;;  %p517_p5 = scmp.lt.s32.totalorder %s511_s14, %s511_s14 }
   0xb   :  { %p518_p6 = por %p517_p5, %p516_p4 }
   0xd   :  { %p519_p7 = pnand %p518_p6, %p512_p3 }
   0xf   :  { %522 = shalt.err (!%p519_p7)
}
  0x10   :  { %s550_s15 = smov 128   ;;  %s551_s16 = smov 8  }
  0x11   :  { %34 = dma.hbm_to_vmem [thread:$0]  %s682_s4, 2048, %s29_s28, [#allocation3], %s550_s15, %s550_s15, %s551_s16  }
  0x12   :  { %s552_s19 = smov [#allocation4]   ;;  %s523_s23 = scalar_lea.hbm %s684_s6, 2048 }
  0x13   :  { %s42_s20 = sshll.u32 %s552_s19, 4  ;;  %p524_p8 = scmp.ne.s32.totalorder %s684_s6, %s523_s23  ;;  %s43_s20 = int_to_ptr.vmem [resolvable:$true] %s42_s20 }
  0x14   :  { %p527_p9 = scmp.lt.u32.totalorder %s523_s23, %s684_s6 }
  0x16   :  { %p529_p10 = pnand %p527_p9, %p524_p8 }
  0x18   :  { %532 = shalt.err (!%p529_p10)
}
  0x19   :  { %s533_s29 = scalar_lea.vmem %s43_s20, 2048  ;;  %p538_p12 = scmp.lt.s32.totalorder %s43_s20, %s43_s20 }
  0x1a   :  { %p534_p11 = scmp.ne.s32.totalorder %s43_s20, %s533_s29  ;;  %p539_p13 = scmp.lt.s32.totalorder %s533_s29, %s533_s29 }
  0x1c   :  { %p540_p0 = por %p539_p13, %p538_p12 }
  0x1e   :  { %p541_p1 = pnand %p540_p0, %p534_p11 }
  0x20   :  { %544 = shalt.err (!%p541_p1)
}
  0x21   :  { %48 = dma.hbm_to_vmem [thread:$0]  %s684_s6, 2048, %s43_s20, [#allocation5], %s550_s15, %s550_s15, %s551_s16  }
  0x22   :  { %545 = dma.done.wait [#allocation3], 2048  }
  0x23   :  { %546 = vsyncadd [#allocation3], 4294965248 }
  0x24   :  { %547 = dma.done.wait [#allocation5], 2048  }
  0x25   :  { %548 = vsyncadd [#allocation5], 4294965248  ;;  %v553_v0 = vmov 0   ;;  %v554_v1 = vmov 1   ;;  %v555_v2 = vmov 0.0|0.0   ;;  %v57_v3 = vld [vmem:[%s678_s0] sm:$0xff] }
  0x26   :  { %497 = vset.pattern.permute.xlu0 %v553_v0  ;;  %498 = vset.pattern.permute.xlu1 %v554_v1  ;;  %v77_v4 = vld [vmem:[%s679_s1] sm:$0xff]  ;;  %v126_v6 = vld [vmem:[#allocation2 + $0x8] sm:$0xff]  ;;  %v127_v7 = vld [vmem:[#allocation2 + $0x10] sm:$0xff]  ;;  %v556_v11 = vmov 2   ;;  %v557_v15 = vmov 3   ;;  %vm558_vm0 = vmmov 0  }
  0x27   :  { %438 = vmatprep.subr.bf16.mxu0 %v555_v2  ;;  %462 = vmatprep.subr.bf16.mxu1 %v555_v2  ;;  %v125_v5 = vld [vmem:[#allocation2] sm:$0xff]  ;;  %v128_v8 = vld [vmem:[#allocation2 + $0x18] sm:$0xff]  ;;  %v130_v13 = vld [vmem:[#allocation2 + $0x28] sm:$0xff]  ;;  %v559_v24 = vmov 0.0   ;;  %vm317_vm1 = vcmask 15360  }
  0x28   :  { %61 = vperm.xlu0 %497, %v57_v3   ;;  %92 = vperm.xlu1 %498, %v77_v4   ;;  %v439_v9 = vpack.c.bf16 %v126_v6, %v125_v5  ;;  %v442_v10 = vpack.c.bf16 %v128_v8, %v127_v7  ;;  %v129_v12 = vld [vmem:[#allocation2 + $0x20] sm:$0xff]  ;;  %v131_v16 = vld [vmem:[#allocation2 + $0x30] sm:$0xff]  ;;  %v132_v17 = vld [vmem:[#allocation2 + $0x38] sm:$0xff] }
  0x29   :  { %v445_v14 = vpack.c.bf16 %v130_v13, %v129_v12  ;;  %v448_v18 = vpack.c.bf16 %v132_v17, %v131_v16  ;;  %v133_v19 = vld [vmem:[#allocation2 + $0x40] sm:$0xff]  ;;  %v134_v20 = vld [vmem:[#allocation2 + $0x48] sm:$0xff]  ;;  %v135_v22 = vld [vmem:[#allocation2 + $0x50] sm:$0xff]  ;;  %400 = vmatprep.mubr.msk.f32.mxu0 %vm558_vm0, %v559_v24  ;;  %435 = vmatprep.mubr.msk.f32.mxu1 %vm558_vm0, %v559_v24 }
  0x2a   :  { %440 = vmatpush3.bf16.msra.mxu0 %v439_v9  ;;  %v451_v21 = vpack.c.bf16 %v134_v20, %v133_v19  ;;  %v136_v23 = vld [vmem:[#allocation2 + $0x58] sm:$0xff]  ;;  %v222_v25 = vld [vmem:[#allocation4] sm:$0xff]  ;;  %v223_v26 = vld [vmem:[#allocation4 + $0x8] sm:$0xff] }
  0x2b   :  { %441 = vmatprep.subr.bf16.mxu0 %v555_v2  ;;  %v224_v27 = vld [vmem:[#allocation4 + $0x10] sm:$0xff]  ;;  %v454_v28 = vpack.c.bf16 %v136_v23, %v135_v22  ;;  %v463_v29 = vpack.c.bf16 %v223_v26, %v222_v25  ;;  %v225_v30 = vld [vmem:[#allocation4 + $0x18] sm:$0xff]  ;;  %v137_v31 = vld [vmem:[#allocation2 + $0x60] sm:$0xff] }
  0x2c   :  { %81 = vperm.xlu0 %497, %v77_v4   ;;  %499 = vset.pattern.permute.xlu1 %v556_v11  ;;  %v138_v32 = vld [vmem:[#allocation2 + $0x68] sm:$0xff]  ;;  %v466_v33 = vpack.c.bf16 %v225_v30, %v224_v27  ;;  %v226_v34 = vld [vmem:[#allocation4 + $0x20] sm:$0xff]  ;;  %v139_v37 = vld [vmem:[#allocation2 + $0x70] sm:$0xff] }
  0x2d   :  { %103 = vperm.xlu1 %499, %v77_v4   ;;  %464 = vmatpush3.bf16.msra.mxu1 %v463_v29  ;;  %v227_v35 = vld [vmem:[#allocation4 + $0x28] sm:$0xff]  ;;  %v457_v36 = vpack.c.bf16 %v138_v32, %v137_v31  ;;  %v140_v38 = vld [vmem:[#allocation2 + $0x78] sm:$0xff]  ;;  %v228_v40 = vld [vmem:[#allocation4 + $0x30] sm:$0xff] }
  0x2e   :  { %443 = vmatpush3.bf16.msra.mxu0 %v442_v10  ;;  %465 = vmatprep.subr.bf16.mxu1 %v555_v2  ;;  %v469_v39 = vpack.c.bf16 %v227_v35, %v226_v34  ;;  %v229_v41 = vld [vmem:[#allocation4 + $0x38] sm:$0xff]  ;;  %v460_v42 = vpack.c.bf16 %v140_v38, %v139_v37  ;;  %v230_v44 = vld [vmem:[#allocation4 + $0x40] sm:$0xff]  ;;  %v231_v45 = vld [vmem:[#allocation4 + $0x48] sm:$0xff] }
  0x2f   :  { %444 = vmatprep.subr.bf16.mxu0 %v555_v2  ;;  %v472_v43 = vpack.c.bf16 %v229_v41, %v228_v40  ;;  %v475_v46 = vpack.c.bf16 %v231_v45, %v230_v44  ;;  %v232_v47 = vld [vmem:[#allocation4 + $0x50] sm:$0xff]  ;;  %v233_v48 = vld [vmem:[#allocation4 + $0x58] sm:$0xff]  ;;  %v325_v50 = vld [vmem:[%s680_s2] ss:$0 sm:$0xff] }
  0x30   :  { %500 = vset.pattern.permute.xlu0 %v557_v15  ;;  %v478_v49 = vpack.c.bf16 %v233_v48, %v232_v47  ;;  %v326_v54 = vld [vmem:[%s681_s3] ss:$0 sm:$0xff]  ;;  %v327_v55 = vld [vmem:[%s680_s2 + $0x1] ss:$0 sm:$0xff]  ;;  %v328_v56 = vld [vmem:[%s680_s2 + $0x2] ss:$0 sm:$0xff] }
  0x31   :  { %114 = vperm.xlu0 %500, %v77_v4   ;;  %467 = vmatpush3.bf16.msra.mxu1 %v466_v33  ;;  %v329_v58 = vld [vmem:[%s680_s2 + $0x3] ss:$0 sm:$0xff]  ;;  %v330_v1 = vld [vmem:[%s680_s2 + $0x4] ss:$0 sm:$0xff]  ;;  %v235_v11 = vld [vmem:[#allocation4 + $0x68] sm:$0xff] }
  0x32   :  { %446 = vmatpush3.bf16.msra.mxu0 %v445_v14  ;;  %468 = vmatprep.subr.bf16.mxu1 %v555_v2  ;;  %v234_v10 = vld [vmem:[#allocation4 + $0x60] sm:$0xff]  ;;  %v236_v13 = vld [vmem:[#allocation4 + $0x70] sm:$0xff]  ;;  %v237_v14 = vld [vmem:[#allocation4 + $0x78] sm:$0xff] }
  0x33   :  { %447 = vmatprep.subr.bf16.mxu0 %v555_v2  ;;  %v481_v12 = vpack.c.bf16 %v235_v11, %v234_v10  ;;  %v484_v15 = vpack.c.bf16 %v237_v14, %v236_v13  ;;  %v331_v17 = vld [vmem:[%s683_s5] ss:$0 sm:$0xff] }
  0x34   :  { %v332_v23 = vld [vmem:[%s685_s7] ss:$0 sm:$0xff] }
  0x35   :  { %470 = vmatpush3.bf16.msra.mxu1 %v469_v39 }
  0x36   :  { %449 = vmatpush3.bf16.msra.mxu0 %v448_v18  ;;  %471 = vmatprep.subr.bf16.mxu1 %v555_v2 }
  0x37   :  { %450 = vmatprep.subr.bf16.mxu0 %v555_v2 }
  0x39   :  { %473 = vmatpush3.bf16.msra.mxu1 %v472_v43 }
  0x3a   :  { %452 = vmatpush3.bf16.msra.mxu0 %v451_v21  ;;  %474 = vmatprep.subr.bf16.mxu1 %v555_v2 }
  0x3b   :  { %453 = vmatprep.subr.bf16.mxu0 %v555_v2 }
  0x3d   :  { %476 = vmatpush3.bf16.msra.mxu1 %v475_v46 }
  0x3e   :  { %455 = vmatpush3.bf16.msra.mxu0 %v454_v28  ;;  %477 = vmatprep.subr.bf16.mxu1 %v555_v2 }
  0x3f   :  { %456 = vmatprep.subr.bf16.mxu0 %v555_v2 }
  0x41   :  { %479 = vmatpush3.bf16.msra.mxu1 %v478_v49 }
  0x42   :  { %458 = vmatpush3.bf16.msra.mxu0 %v457_v36  ;;  %480 = vmatprep.subr.bf16.mxu1 %v555_v2 }
  0x43   :  { %459 = vmatprep.subr.bf16.mxu0 %v555_v2 }
  0x45   :  { %482 = vmatpush3.bf16.msra.mxu1 %v481_v12 }
  0x46   :  { %461 = vmatpush3.bf16.msra.mxu0 %v460_v42  ;;  %483 = vmatprep.subr.bf16.mxu1 %v555_v2 }
  0x49   :  { %485 = vmatpush3.bf16.msra.mxu1 %v484_v15 }
  0xa7   :  { %v62_v51 = vpop.permute.xlu0 %61  ;;  %v93_v52 = vpop.permute.xlu1 %92 }
  0xa8   :  { %v68_v53 = vmul.f32 %v325_v50, %v62_v51  ;;  %v99_v62 = vmul.f32 %v328_v56, %v93_v52 }
  0xaa   :  { %v76_v59 = vadd.f32 %v326_v54, %v68_v53 }
  0xab   :  { %v82_v57 = vpop.permute.xlu0 %81 }
  0xac   :  { %v88_v60 = vmul.f32 %v327_v55, %v82_v57  ;;  %v104_v61 = vpop.permute.xlu1 %103 }
  0xad   :  { %v110_v0 = vmul.f32 %v329_v58, %v104_v61 }
  0xae   :  { %v89_v63 = vadd.f32 %v88_v60, %v76_v59 }
  0xb0   :  { %v100_v3 = vadd.f32 %v99_v62, %v89_v63  ;;  %v115_v4 = vpop.permute.xlu0 %114 }
  0xb1   :  { %v121_v5 = vmul.f32 %v330_v1, %v115_v4 }
  0xb2   :  { %v111_v6 = vadd.f32 %v110_v0, %v100_v3 }
  0xb4   :  { %v122_v7 = vadd.f32 %v121_v5, %v111_v6 }
  0xb6   :  { %v123_v8 = vmax.f32 %v122_v7, 0.0 }
  0xb8   :  { %v124_v9 = vmin.f32 %v123_v8, 10.0 }
  0xba   :  { %401 = vmatmul.mubr.f32.vlgmr.msra.gmra.mrb[0].mxu0 %v124_v9 }
 0x18d   :  { %v207_v16 = vpop.f32.mrb[0].mxu0 }
 0x18e   :  { %v211_v18 = vadd.f32 %v207_v16, %v124_v9  ;;  %v402_v19 = vpop.f32.mrb[1].mxu0 }
 0x190   :  { %v219_v20 = vadd.f32 %v331_v17, %v211_v18 }
 0x192   :  { %v220_v21 = vmax.f32 %v219_v20, 0.0 }
 0x194   :  { %v221_v22 = vmin.f32 %v220_v21, 10.0 }
 0x196   :  { %436 = vmatmul.mubr.f32.vlgmr.msra.gmra.mrb[0].mxu1 %v221_v22 }
 0x269   :  { %v311_v2 = vpop.f32.mrb[0].mxu1 }
 0x26a   :  { %v312_v24 = vadd.f32 %v332_v23, %v311_v2  ;;  %v437_v25 = vpop.f32.mrb[1].mxu1 }
 0x26c   :  { %v333_v26 = vclamps-f32 %v312_v24, 10.0 }
 0x26e   :  { %318 = vst.msk [vmem:[%s686_s8] sm:$0xff] %vm317_vm1, %v333_v26 }
 0x26f   :  { %323 = vsyncpa [#allocation3], 1 }
 0x270   :  { %324 = vsyncpa [#allocation5], 1 }

</bundles_post_ra>
